<compile_context>
chip_gen: v7x
topology: tpu7x:2x2x1
jax: 0.10.0
libtpu: 0.0.40
codegen_flags: <defaults>
</compile_context>

<pallas_src>
import jax
import jax.numpy as jnp
from jax.experimental import pallas as pl
from jax.experimental.pallas import tpu as pltpu

MAX_LEN = 143


def build_encoding_table(embedding_dim: int, dtype=jnp.float32) -> jnp.ndarray:
    """Deterministic sinusoidal table, identical math to the torch __init__ (even E)."""
    pos = jnp.arange(MAX_LEN, dtype=jnp.float32)[:, None]                 # (max_len, 1)
    i_rng = jnp.arange(0, embedding_dim, 2, dtype=jnp.float32)            # (ceil(E/2),)
    trig_idx = pos / (10000.0 ** (i_rng / embedding_dim))                 # (max_len, E/2)
    enc = jnp.zeros((MAX_LEN, embedding_dim), dtype=jnp.float32)
    enc = enc.at[:, 0::2].set(jnp.sin(trig_idx))
    enc = enc.at[:, 1::2].set(jnp.cos(trig_idx)[:, : embedding_dim // 2])
    return enc.astype(dtype)                                              # (max_len, E)


def _pe_add_kernel(x_ref, pe_ref, o_ref):
    # x_ref / o_ref: (bt, fc); pe_ref: (1, fc) -> broadcast over the sublane axis.
    o_ref[...] = x_ref[...] + pe_ref[...]


def _choose_tiles(b: int, flat: int, itemsize: int):
    """Pick (bt, fc): batch-row tile and flat-lane chunk."""
    # Sub-32-bit dtypes pack along sublanes: keep bt a multiple of the packing.
    sub_mult = {4: 8, 2: 16, 1: 32}.get(itemsize, 8)
    target_block_bytes = 4 * 1024 * 1024      # ~4 MiB per block

    lane_splittable = (flat % 128 == 0) and flat > 128

    # Lane chunk: big enough to amortize per-step overhead, small enough that a
    # sub_mult-row slice still fits the block budget. This kills the old
    # (1, S*E) fallback: oversized rows get split along lanes, never 8x-padded.
    if lane_splittable:
        max_fc = max(128, (target_block_bytes // (sub_mult * itemsize)) // 128 * 128)
        fc = min(flat, max_fc)
    else:
        fc = flat                              # full lane extent (128-rule exempt)

    # Batch-row tile: multiple of the packed sublane count, or the full extent.
    max_bt = max(1, target_block_bytes // (fc * itemsize))
    if max_bt >= b:
        bt = b
    else:
        bt = min(b, max(sub_mult, (max_bt // sub_mult) * sub_mult))

    def steps(bt_, fc_):
        return pl.cdiv(b, bt_) * pl.cdiv(flat, fc_)

    # Guarantee pipeline depth (>= 4 steps where the shapes allow) so writeback
    # of block i-1 overlaps the fetch of block i+1, and so v7x's two
    # TensorCores both get work on the "parallel" axes.
    while steps(bt, fc) < 4 and lane_splittable and fc > 128:
        fc = max(128, ((fc // 2) // 128) * 128)
    while steps(bt, fc) < 4 and bt > sub_mult:
        nbt = max(sub_mult, ((bt // 2) // sub_mult) * sub_mult)
        if nbt == bt:
            break
        bt = nbt

    return bt, fc


def positional_encoding_forward(x: jnp.ndarray, encoding: jnp.ndarray) -> jnp.ndarray:
    """x: (B, S, E); encoding: (max_len, E). Returns x + encoding[:S] broadcast over batch."""
    b, s, e = x.shape
    max_len, e_enc = encoding.shape
    assert e == e_enc, f"embedding dim mismatch: {e} vs {e_enc}"
    assert s <= max_len, f"seq_len {s} exceeds max_len {max_len}"

    flat = s * e
    itemsize = jnp.dtype(x.dtype).itemsize

    # Lane-dense 2-D views: last dim is S*E (a large multiple of 128 for typical
    # even E), so vector stores are full-width instead of masked.
    x2 = x.reshape(b, flat)
    pe2 = encoding[:s, :].astype(x.dtype).reshape(1, flat)

    bt, fc = _choose_tiles(b, flat, itemsize)
    grid_f = pl.cdiv(flat, fc)
    grid_b = pl.cdiv(b, bt)

    # Explicit scoped-VMEM budget: double-buffered in + out blocks, the
    # sublane-padded (double-buffered) pe slab, plus headroom. At least 32 MiB
    # (v5e's default is only 16), capped below v7x's 64 MiB physical VMEM.
    block_bytes = bt * fc * itemsize
    pe_slab_bytes = 2 * 8 * fc * 4             # 8-sublane (packed-equivalent) padding
    vmem_limit_bytes = int(min(max(4 * block_bytes + pe_slab_bytes + (4 << 20),
                                   32 << 20),
                               56 << 20))

    cost = pl.CostEstimate(
        flops=b * flat,                                        # one add per element
        transcendentals=0,
        bytes_accessed=2 * b * flat * itemsize + flat * itemsize,
    )

    out2 = pl.pallas_call(
        _pe_add_kernel,
        out_shape=jax.ShapeDtypeStruct((b, flat), x.dtype),
        grid_spec=pltpu.PrefetchScalarGridSpec(
            num_scalar_prefetch=0,
            # Flat-lane axis outermost: pe's block index only changes with j, so
            # the resident slab is re-fetched grid_f times, not every step.
            grid=(grid_f, grid_b),
            in_specs=[
                pl.BlockSpec((bt, fc), lambda j, i: (i, j)),   # x tile
                pl.BlockSpec((1, fc), lambda j, i: (0, j)),    # pe slab (resident per j)
            ],
            out_specs=pl.BlockSpec((bt, fc), lambda j, i: (i, j)),
        ),
        compiler_params=pltpu.CompilerParams(
            # Every output block is written exactly once -> both axes parallel,
            # letting v7x's two TensorCores split the grid.
            dimension_semantics=("parallel", "parallel"),
            vmem_limit_bytes=vmem_limit_bytes,
        ),
        cost_estimate=cost,
        # Mirrors the torch module's in-place `x += pe`; under jit with donation
        # this removes the separate HBM output allocation.
        input_output_aliases={0: 0},
    )(x2, pe2)

    return out2.reshape(b, s, e)


if __name__ == "__main__":
    batch, seq_len, embedding_dim = 2, 8, 32

    key = jax.random.PRNGKey(0)
    x = jax.random.normal(key, (batch, seq_len, embedding_dim), dtype=jnp.float32)

    encoding = build_encoding_table(embedding_dim, dtype=x.dtype)

    # Reference in plain JAX (same semantics as the torch forward), computed first.
    ref = x + encoding[None, :seq_len, :]

    out = positional_encoding_forward(x, encoding)
    out = jax.block_until_ready(out)

    assert out.shape == (batch, seq_len, embedding_dim)
    assert jnp.allclose(out, ref, atol=1e-6), "mismatch vs reference"

    print("KERNEL_OK")
</pallas_src>

<mosaic_0001>
module attributes {stable_mosaic.version = 11 : i64} {
  func.func @_pe_add_kernel(%arg0: i32, %arg1: i32, %arg2: memref<2x128xf32, #tpu.memory_space<vmem>>, %arg3: memref<1x128xf32, #tpu.memory_space<vmem>>, %arg4: memref<2x128xf32, #tpu.memory_space<vmem>>) attributes {dimension_semantics = [#tpu.dimension_semantics<parallel>, #tpu.dimension_semantics<parallel>], iteration_bounds = array<i64: 2, 1>, scalar_prefetch = 0 : i64, scratch_operands = 0 : i64, tpu.core_type = #tpu.core_type<tc>, window_params = [{transform_indices = @transform_0, window_bounds = array<i64: 2, 128>}, {transform_indices = @transform_1, window_bounds = array<i64: 1, 128>}, {transform_indices = @transform_2, window_bounds = array<i64: 2, 128>}]} {
    %c0 = arith.constant 0 : index
    %c0_0 = arith.constant 0 : index
    %0 = vector.load %arg2[%c0, %c0_0] : memref<2x128xf32, #tpu.memory_space<vmem>>, vector<2x128xf32>
    %c0_1 = arith.constant 0 : index
    %c0_2 = arith.constant 0 : index
    %1 = vector.load %arg3[%c0_1, %c0_2] : memref<1x128xf32, #tpu.memory_space<vmem>>, vector<1x128xf32>
    %2 = vector.broadcast %1 : vector<1x128xf32> to vector<2x128xf32>
    %3 = arith.addf %0, %2 : vector<2x128xf32>
    %c0_3 = arith.constant 0 : index
    %c0_4 = arith.constant 0 : index
    %4 = vector.load %arg4[%c0_3, %c0_4] : memref<2x128xf32, #tpu.memory_space<vmem>>, vector<2x128xf32>
    tpu.vector_store %arg4[%c0_3, %c0_4], %3 {strides = array<i32>} : memref<2x128xf32, #tpu.memory_space<vmem>>, vector<2x128xf32>,
    return
  }
  func.func @transform_0(%arg0: i32, %arg1: i32) -> (i32, i32) {
    %c0_i32 = arith.constant 0 : i32
    return %arg1, %arg0 : i32, i32
  }
  func.func @transform_1(%arg0: i32, %arg1: i32) -> (i32, i32) {
    %c0_i32 = arith.constant 0 : i32
    %c0_i32_0 = arith.constant 0 : i32
    return %c0_i32, %arg0 : i32, i32
  }
  func.func @transform_2(%arg0: i32, %arg1: i32) -> (i32, i32) {
    %c0_i32 = arith.constant 0 : i32
    return %arg1, %arg0 : i32, i32
  }
}

</mosaic_0001>

<bundles_post_ra>
// kernel: tpu_custom_call.1
= control target key start
LH: loop header
LB: loop body
LE: loop exit
PB: predicated region body
PF: predicated region fallthrough
CT: control target
= control target key end

     0   :  { %7 = vsyncpa [#allocation3], 0  ;;  %s692_s0 = inlined_call_operand.hbm [shape: f32[2,256], index: 0, kind: input, shape index: {}, may-alias: {0,2}]   ;;  %s693_s1 = inlined_call_operand.vmem [shape: f32[1,256], index: 1, kind: input, shape index: {}]   ;;  %s694_s2 = inlined_call_operand.hbm [shape: f32[2,256], index: 2, kind: output, shape index: {}, may-alias: {0,2}]  }
   0x1   :  { %9 = vsyncpa [#allocation3 + $0x1], 0 }
   0x2   :  { %10 = vsyncpa [#allocation4], 0 }
   0x3   :  { %12 = vsyncpa [#allocation4 + $0x1], 0  ;;  %s515_s9 = smov 0   ;;  %s517_s10 = smov 0  }
   0x4   :  { %s519_s11 = smov 0   ;;  %s521_s12 = smov 0  }
   0x5   :  { %s523_s13 = smov 0   ;;  %s525_s14 = smov 0  }
   0x6 LB: > { %s308_s15 = sadd.s32 4294967295, %s496_s14   ;;  %s309_s16 = sadd.s32 4294967294, %s496_s14   ;;  %s496_s14 = sphi %s525_s14, %s18_s14   ;;  %s492_s13 = sphi %s523_s13, %s710_s13   ;;  %s488_s12 = sphi %s521_s12, %s709_s12   ;;  %s484_s11 = sphi %s519_s11, %s708_s11   ;;  %s480_s10 = sphi %s517_s10, %s707_s10   ;;  %s476_s9 = sphi %s515_s9, %s706_s9  }
   0x7   : > { %s30_s17 = sadd.s32 1, %s492_s13  ;;  %s39_s18 = sadd.s32 1, %s484_s11 }
   0x8   : > { %p32_p0 = scmp.ge.s32.totalorder %s30_s17, 2  ;;  %p46_p1 = scmp.ne.s32.totalorder %s484_s11, %s480_s10 }
   0x9   : > { %p47_p2 = scmp.eq.s32.totalorder %s496_s14, 0  ;;  %p52_p3 = scmp.ne.s32.totalorder %s480_s10, %s476_s9 }
   0xa   : > { %s712_s17 = smov (%p32_p0, %s30_s17), 0  ;;  %p53_p5 = scmp.eq.s32.totalorder %s308_s15, 0 }
   0xb   : > { %p556_p4 = por %p47_p2, %p46_p1  ;;  %s35_s20 = ssub.s32 %s492_s13, %s712_s17 }
   0xc   : > { %p104_p6 = scmp.eq.s32.totalorder %s308_s15, 1  ;;  %p37_p7 = scmp.eq.s32.totalorder %s35_s20, 0 }
   0xd   : > { %p562_p8 = por %p53_p5, %p52_p3  ;;  %p110_p10 = scmp.eq.s32.totalorder %s309_s16, 1 }
   0xe   : > { %p566_p9 = por %p104_p6, %p46_p1  ;;  %p334_p13 = scmp.lt.s32.totalorder %s496_s14, 2 }
   0xf   : > { %s571_s23 = scalar_select %p37_p7, %s484_s11, %s39_s18  }
  0x10   : > { %s698_s22 = scalar_select %p566_p9, 1, 0 }
  0x11   : > { %p573_p11 = por %p110_p10, %p52_p3  ;;  %s130_s25 = sand.u32 1, %s484_s11  }
  0x12   : > { %s312_s26 = sshll.u32 %s130_s25, 1  ;;  %s313_s27 = sshll.u32 %s492_s13, 5 }
  0x13   : > { %s699_s24 = scalar_select %p573_p11, 1, 0 }
  0x14   : > { %s584_s30 = scalar_lea.hbm %s692_s0, %s313_s27  ;;  %s134_s3 = scalar_lea.vmem [#allocation2], %s312_s26 }
  0x15   : > { %s143_s4 = sshll.u32 %s134_s3, 4  ;;  %p590_p0 = pnand %p334_p13, %p556_p4  ;;  %s586_s4 = int_to_ptr.vmem [resolvable:$true] %s143_s4 }
  0x16   : > { %s131_s6 = scalar_lea.sflag [#allocation3], %s130_s25  ;;  %s384_s7 = scalar_lea.hbm %s584_s30, 32 }
  0x17   : > { %p385_p3 = scmp.ne.s32.totalorder %s584_s30, %s384_s7  ;;  %p386_p5 = pneg %p590_p0 }
  0x18   : > { %s389_s16 = scalar_lea.hbm %s692_s0, 64  ;;  %p390_p4 = scmp.lt.u32.totalorder %s584_s30, %s692_s0 }
  0x19   : > { %p387_p6 = pnand %p386_p5, %p385_p3  ;;  %p391_p10 = scmp.lt.u32.totalorder %s389_s16, %s384_s7 }
  0x1a   : > { %p393_p12 = scmp.lt.u32.totalorder %s384_s7, %s584_s30 }
  0x1b   : > { %p388_p7 = pneg %p387_p6  ;;  %p392_p13 = por %p391_p10, %p390_p4 }
  0x1d   : > { %p394_p1 = por %p393_p12, %p392_p13 }
  0x1f   : > { %p395_p2 = pnand %p394_p1, %p388_p7 }
  0x21   : > { %398 = shalt.err (!%p395_p2)
}
  0x22   : > { %s399_s20 = scalar_lea.vmem %s586_s4, 32  ;;  %s498_s25 = smov [#allocation2]  }
  0x23   : > { %p400_p3 = scmp.ne.s32.totalorder %s586_s4, %s399_s20  ;;  %s404_s26 = sshll.u32 %s498_s25, 4  ;;  %s405_s26 = int_to_ptr.vmem [resolvable:$false] %s404_s26 }
  0x24   : > { %s406_s27 = scalar_lea.vmem %s405_s26, 64  ;;  %p407_p9 = scmp.lt.s32.totalorder %s586_s4, %s405_s26 }
  0x25   : > { %p402_p6 = pnand %p400_p3, %p386_p5  ;;  %p408_p4 = scmp.lt.s32.totalorder %s406_s27, %s399_s20 }
  0x27   : > { %p403_p11 = pneg %p402_p6  ;;  %p409_p10 = por %p408_p4, %p407_p9 }
  0x29   : > { %p410_p12 = pnand %p409_p10, %p403_p11 }
  0x2b   : > { %413 = shalt.err (!%p410_p12)
}
  0x2c   : > { %329 = dma.hbm_to_vmem [thread:$0]  (!%p590_p0), %s584_s30, 32, %s586_s4, %s131_s6  }
  0x2d   : > { %p701_p1 = scmp.lt.s32.totalorder %s496_s14, 3  ;;  %p702_p2 = scmp.ge.s32.totalorder %s496_s14, 1 }
  0x2f   : > { %p155_p5 = pnand %p702_p2, %p701_p1 }
  0x30   : > { %s626_s28 = sand.u32 (!%p155_p5), 1, %s480_s10  }
  0x31   : > { %158 = sbr.rel (%p155_p5) target bundleno = 85 (0x55), region = 28  ;;  %s315_s29 = sshll.u32 (!%p155_p5), %s626_s28, 1 }
  0x32   : > { %s161_s3 = scalar_lea.sflag (!%p155_p5), [#allocation3], %s626_s28  ;;  %s164_s7 = scalar_lea.vmem (!%p155_p5), [#allocation2], %s315_s29 }
  0x38   : > { %467 = dma.done.wait (%p562_p8), %s161_s3, 32  }
  0x39   : > { %469 = vsyncadd (%p562_p8), %s161_s3, 4294967264  ;;  %p188_p9 = scmp.lt.s32.totalorder %s488_s12, 1  ;;  %s187_s8 = scalar_lea.vmem [#allocation5], %s315_s29  ;;  %v191_v0 = vld [vmem:[%s164_s7] sm:$0x3] }
  0x3a   : > { %s217_s15 = sshll.u32 %s187_s8, 4  ;;  %s319_s16 = sshll.u32 %s488_s12, 5  ;;  %s640_s15 = int_to_ptr.vmem [resolvable:$true] %s217_s15 }
  0x3b   : > { %s189_s30 = scalar_select %p188_p9, %s488_s12, 1 }
  0x3c   : > { %s645_s19 = scalar_lea.hbm %s694_s2, %s319_s16  ;;  %s202_s20 = scalar_lea.sflag [#allocation4], %s626_s28 }
  0x3d   : > { %s190_s6 = scalar_lea.vmem %s693_s1, %s189_s30  ;;  %s414_s25 = scalar_lea.vmem %s640_s15, 32 }
  0x3e   : > { %v317_v1 = vld [vmem:[%s190_s6] ss:$0 sm:$0xff]  ;;  %p415_p8 = scmp.ne.s32.totalorder %s640_s15, %s414_s25  ;;  %p703_p11 = scmp.ne.s32.totalorder %s698_s22, 0 }
  0x3f   : > { %v199_v2 = vadd.f32 %v317_v1, %v191_v0  ;;  %s499_s12 = smov [#allocation5]  }
  0x40   : > { %p416_p0 = pnand %p415_p8, %p703_p11  ;;  %s418_s26 = sshll.u32 %s499_s12, 4  ;;  %s419_s26 = int_to_ptr.vmem [resolvable:$false] %s418_s26 }
  0x41   : > { %200 = vst [vmem:[%s187_s8] sm:$0x3] %v199_v2  ;;  %s420_s27 = scalar_lea.vmem %s419_s26, 64  ;;  %p421_p13 = scmp.lt.s32.totalorder %s640_s15, %s419_s26 }
  0x42   : > { %p417_p7 = pneg %p416_p0  ;;  %p422_p3 = scmp.lt.s32.totalorder %s420_s27, %s414_s25 }
  0x44   : > { %p423_p6 = por %p422_p3, %p421_p13 }
  0x46   : > { %p424_p4 = pnand %p423_p6, %p417_p7 }
  0x48   : > { %427 = shalt.err (!%p424_p4)
}
  0x49   : > { %s428_s28 = scalar_lea.hbm %s645_s19, 32  ;;  %s432_s7 = scalar_lea.hbm %s694_s2, 64 }
  0x4a   : > { %p429_p10 = scmp.ne.s32.totalorder %s645_s19, %s428_s28  ;;  %p433_p2 = scmp.lt.u32.totalorder %s645_s19, %s694_s2 }
  0x4b   : > { %p434_p5 = scmp.lt.u32.totalorder %s432_s7, %s428_s28  ;;  %p436_p8 = scmp.lt.u32.totalorder %s428_s28, %s645_s19 }
  0x4c   : > { %p430_p12 = pnand %p429_p10, %p703_p11 }
  0x4d   : > { %p435_p9 = por %p434_p5, %p433_p2 }
  0x4e   : > { %p431_p1 = pneg %p430_p12 }
  0x4f   : > { %p437_p0 = por %p436_p8, %p435_p9 }
  0x51   : > { %p438_p7 = pnand %p437_p0, %p431_p1 }
  0x53   : > { %441 = shalt.err (!%p438_p7)
}
  0x54   : > { %324 = dma.vmem_to_hbm [thread:$0]  (%p703_p11), %s640_s15, 32, %s645_s19, %s202_s20  }
  0x55 PF: > { %s229_s5 = sand.u32 1, %s476_s9   ;;  %p704_p13 = scmp.ne.s32.totalorder %s699_s24, 0 }
  0x56   : > { %p705_p3 = scmp.ge.s32.totalorder %s496_s14, 2  ;;  %s230_s6 = scalar_lea.sflag [#allocation4], %s229_s5 }
  0x58   : > { %p331_p6 = pnand %p705_p3, %p704_p13 }
  0x5a   : > { %471 = dma.done.wait (!%p331_p6), %s230_s6, 32  }
  0x5b   : > { %473 = vsyncadd (!%p331_p6), %s230_s6, 4294967264  ;;  %s18_s14 = sadd.s32 1, %s496_s14   ;;  %s706_s9 = smov %s480_s10 }
  0x5c   : > { %p15_p4 = scmp.ge.s32.totalorder %s18_s14, 4   ;;  %s707_s10 = smov %s484_s11 }
  0x5d   : > { %s708_s11 = smov %s571_s23  ;;  %s709_s12 = smov %s492_s13 }
  0x5e   : > { %s710_s13 = smov %s712_s17  ;;  %17 = sbr.rel (!%p15_p4) target bundleno = 6 (0x6), region = 76 }
  0x65   :  { %235 = vsyncpa [#allocation3], 1 }
  0x66   :  { %237 = vsyncpa [#allocation3 + $0x1], 1 }
  0x67   :  { %238 = vsyncpa [#allocation4], 1 }
  0x68   :  { %240 = vsyncpa [#allocation4 + $0x1], 1 }

</bundles_post_ra>
